<compile_context>
chip_gen: v7x
topology: tpu7x:2x2x1
jax: 0.10.0
libtpu: 0.0.40
codegen_flags: <defaults>
</compile_context>

<pallas_src>
import math

import jax
import jax.numpy as jnp
from jax.experimental import pallas as pl
from jax.experimental.pallas import tpu as pltpu


def _sinusoidal_kernel(x_ref, freqs_ref, o_ref):
    # x_ref: (TILE_B, 1) f32, freqs_ref: (1, half) f32, o_ref: (TILE_B, dim) f32
    half = o_ref.shape[1] // 2
    emb = x_ref[...] * freqs_ref[...]          # (TILE_B,1)*(1,half) -> (TILE_B,half)
    # Two slice stores (same bytes as concat, no cross-lane shuffle, fewer live vregs).
    o_ref[:, :half] = jnp.sin(emb)
    o_ref[:, half:] = jnp.cos(emb)


# Per-output-tile VMEM budget (bytes). Double buffering doubles it, so 4 MiB
# keeps the pipeline well inside v5e's 16 MiB scoped default and v7x's 32 MiB.
_VMEM_TILE_BUDGET = 4 * 1024 * 1024
_MAX_TILE_B = 2048  # 512-2048 rows is the measured ~85%-of-roofline regime


def _choose_tile_b(b, dim):
    row_bytes = dim * 4  # f32 output row
    tile_b = min(_MAX_TILE_B, max(8, _VMEM_TILE_BUDGET // row_bytes))
    tile_b = max(8, (tile_b // 8) * 8)  # f32 sublane multiple
    if b <= tile_b:
        return b                        # full extent is always a legal block
    return tile_b


def sinusoidal_pos_emb(x, dim):
    """x: (B,) array of positions/timesteps; returns (B, dim) float32 embedding."""
    assert dim % 2 == 0 and dim // 2 > 1
    b = x.shape[0]
    half = dim // 2

    x2d = x.astype(jnp.float32).reshape(b, 1)

    # Frequency table computed once (tiny XLA op), passed as a resident input:
    # removes the per-element exp from the kernel's EUP path.
    scale = -(math.log(10000.0) / (half - 1))
    freqs = jnp.exp(jnp.arange(half, dtype=jnp.float32) * scale).reshape(1, half)

    tile_b = _choose_tile_b(b, dim)
    grid = (pl.cdiv(b, tile_b),)

    # TODO(synk): for dim < 128 the lane axis is under-filled (masked stores);
    # a transposed / fused layout would be needed for full lane density, but the
    # module's contract is a (B, dim) output so we keep that layout here.
    return pl.pallas_call(
        _sinusoidal_kernel,
        out_shape=jax.ShapeDtypeStruct((b, dim), jnp.float32),
        grid=grid,
        in_specs=[
            pl.BlockSpec((tile_b, 1), lambda i: (i, 0)),
            pl.BlockSpec((1, half), lambda i: (0, 0)),   # resident freq table
        ],
        out_specs=pl.BlockSpec((tile_b, dim), lambda i: (i, 0)),
        compiler_params=pltpu.CompilerParams(
            dimension_semantics=("parallel",),           # independent tiles
            vmem_limit_bytes=32 * 1024 * 1024,           # safe on v5e/v6e/v7x
        ),
    )(x2d, freqs)


def _reference(x, dim):
    half = dim // 2
    emb = math.log(10000.0) / (half - 1)
    emb = jnp.exp(jnp.arange(half, dtype=jnp.float32) * -emb)
    emb = x.astype(jnp.float32)[:, None] * emb[None, :]
    return jnp.concatenate([jnp.sin(emb), jnp.cos(emb)], axis=-1)


if __name__ == "__main__":
    key = jax.random.PRNGKey(0)

    # Small shape consistent with the module (diffusion timestep embedding).
    batch, dim = 8, 32
    x = jax.random.uniform(key, (batch,), dtype=jnp.float32) * 100.0
    out = jax.block_until_ready(sinusoidal_pos_emb(x, dim))
    ref = _reference(x, dim)
    assert out.shape == (batch, dim), out.shape
    assert jnp.allclose(out, ref, atol=1e-5, rtol=1e-5), "mismatch vs reference (small)"

    # Second check exercising the multi-tile (pipelined, parallel-grid) path.
    batch2, dim2 = 4096, 64
    x2 = jax.random.uniform(jax.random.PRNGKey(1), (batch2,), dtype=jnp.float32) * 1000.0
    out2 = jax.block_until_ready(sinusoidal_pos_emb(x2, dim2))
    ref2 = _reference(x2, dim2)
    assert out2.shape == (batch2, dim2), out2.shape
    assert jnp.allclose(out2, ref2, atol=1e-4, rtol=1e-5), "mismatch vs reference (tiled)"

    print("KERNEL_OK")
</pallas_src>

<mosaic_0001>
module attributes {stable_mosaic.version = 11 : i64} {
  func.func @_sinusoidal_kernel(%arg0: i32, %arg1: memref<8x1xf32, #tpu.memory_space<vmem>>, %arg2: memref<1x16xf32, #tpu.memory_space<vmem>>, %arg3: memref<8x32xf32, #tpu.memory_space<vmem>>) attributes {dimension_semantics = [#tpu.dimension_semantics<parallel>], iteration_bounds = array<i64: 1>, scalar_prefetch = 0 : i64, scratch_operands = 0 : i64, tpu.core_type = #tpu.core_type<tc>, window_params = [{transform_indices = @transform_0, window_bounds = array<i64: 8, 1>}, {pipeline_mode = #tpu.pipeline_mode<synchronous>, transform_indices = @transform_1, window_bounds = array<i64: 1, 16>}, {transform_indices = @transform_2, window_bounds = array<i64: 8, 32>}]} {
    %c0 = arith.constant 0 : index
    %c0_0 = arith.constant 0 : index
    %0 = vector.load %arg1[%c0, %c0_0] : memref<8x1xf32, #tpu.memory_space<vmem>>, vector<8x1xf32>
    %c0_1 = arith.constant 0 : index
    %c0_2 = arith.constant 0 : index
    %1 = vector.load %arg2[%c0_1, %c0_2] : memref<1x16xf32, #tpu.memory_space<vmem>>, vector<1x16xf32>
    %2 = vector.broadcast %0 : vector<8x1xf32> to vector<8x16xf32>
    %3 = vector.broadcast %1 : vector<1x16xf32> to vector<8x16xf32>
    %4 = arith.mulf %2, %3 : vector<8x16xf32>
    %5 = math.sin %4 : vector<8x16xf32>
    %c0_3 = arith.constant 0 : index
    %c0_4 = arith.constant 0 : index
    %6 = vector.load %arg3[%c0_3, %c0_4] : memref<8x32xf32, #tpu.memory_space<vmem>>, vector<8x16xf32>
    tpu.vector_store %arg3[%c0_3, %c0_4], %5 {strides = array<i32>} : memref<8x32xf32, #tpu.memory_space<vmem>>, vector<8x16xf32>,
    %7 = math.cos %4 : vector<8x16xf32>
    %c0_5 = arith.constant 0 : index
    %c16 = arith.constant 16 : index
    %8 = vector.load %arg3[%c0_5, %c16] : memref<8x32xf32, #tpu.memory_space<vmem>>, vector<8x16xf32>
    tpu.vector_store %arg3[%c0_5, %c16], %7 {strides = array<i32>} : memref<8x32xf32, #tpu.memory_space<vmem>>, vector<8x16xf32>,
    return
  }
  func.func @transform_0(%arg0: i32) -> (i32, i32) {
    %c0_i32 = arith.constant 0 : i32
    %c0_i32_0 = arith.constant 0 : i32
    return %arg0, %c0_i32 : i32, i32
  }
  func.func @transform_1(%arg0: i32) -> (i32, i32) {
    %c0_i32 = arith.constant 0 : i32
    %c0_i32_0 = arith.constant 0 : i32
    %c0_i32_1 = arith.constant 0 : i32
    return %c0_i32, %c0_i32_0 : i32, i32
  }
  func.func @transform_2(%arg0: i32) -> (i32, i32) {
    %c0_i32 = arith.constant 0 : i32
    %c0_i32_0 = arith.constant 0 : i32
    return %arg0, %c0_i32 : i32, i32
  }
}

</mosaic_0001>

<bundles_post_ra>
// kernel: tpu_custom_call.1
= control target key start
LH: loop header
LB: loop body
LE: loop exit
PB: predicated region body
PF: predicated region fallthrough
CT: control target
= control target key end

     0   :  { %v306_v1 = vmov 0   ;;  %s370_s0 = inlined_call_operand.vmem [shape: f32[8,1], index: 0, kind: input, shape index: {}]   ;;  %s371_s1 = inlined_call_operand.vmem [shape: f32[1,16], index: 1, kind: input, shape index: {}]   ;;  %s372_s2 = inlined_call_operand.hbm [shape: f32[8,32], index: 2, kind: output, shape index: {}]  }
   0x1   :  { %v12_v0 = vld [vmem:[%s370_s0] sm:$0xff]  ;;  %277 = vset.pattern.permute.xlu0 %v306_v1 }
   0x2   :  { %16 = vperm.xlu0 %277, %v12_v0  }
   0x3   :  { %7 = vsyncpa [#allocation3], 0  ;;  %v255_v2 = vld [vmem:[%s371_s1] ss:$0 sm:$0xff]  ;;  %v307_v15 = vmov 683565275  }
   0x4   :  { %v308_v17 = vmov 2475754826   ;;  %v309_v20 = vmov 2131351028   ;;  %v310_v23 = vmov 2102212464  }
   0x5   :  { %v311_v26 = vmov 920167782   ;;  %v312_v29 = vmov 1326507024   ;;  %vm130_vm11 = vcmask 130048   ;;  %s313_s0 = smov 16  }
   0x6   :  { %s314_s1 = smov [#allocation2]  }
   0x7   :  { %s247_s13 = sshll.u32 %s314_s1, 4  ;;  %s248_s13 = int_to_ptr.vmem [resolvable:$true] %s247_s13 }
   0x8   :  { %s282_s14 = scalar_lea.vmem %s248_s13, 128  ;;  %p287_p1 = scmp.lt.s32.totalorder %s248_s13, %s248_s13 }
   0x9   :  { %p283_p0 = scmp.ne.s32.totalorder %s248_s13, %s282_s14  ;;  %p288_p2 = scmp.lt.s32.totalorder %s282_s14, %s282_s14 }
   0xb   :  { %p289_p3 = por %p288_p2, %p287_p1 }
   0xd   :  { %p290_p4 = pnand %p289_p3, %p283_p0 }
  0x81   :  { %v17_v3 = vpop.permute.xlu0 %16 }
  0x82   :  { %v336_v4 = vmul.f32 %v255_v2, %v17_v3 }
  0x84   :  { %v29_v5 = vand.u32 2139095040, %v336_v4  ;;  %v26_v9 = vand.u32 2147483647, %v336_v4  ;;  %vm28_vm7 = vcmp.lt.s32.totalorder %v336_v4, 0 }
  0x86   :  { %v30_v6 = vshrl.u32 %v29_v5, 23  ;;  %v33_v12 = vand.u32 8388607, %v26_v9  ;;  %vm27_vm8 = vcmp.le.f32.partialorder %v26_v9, 0.7853982 }
  0x88   :  { %v256_v7 = vadd.s32 4294967169, %v30_v6  ;;  %v34_v31 = vor.u32 8388608, %v33_v12 }
  0x8a   :  { %v36_v8 = vadd.s32 1, %v256_v7  ;;  %v74_v45 = vshll.u32 %v34_v31, 8 }
  0x8c   :  { %vm37_vm0 = vcmp.gt.s32.totalorder %v36_v8, 0 }
  0x8d   :  { %v38_v10 = vsel %vm37_vm0, %v36_v8, 0  ;;  %vm118_vm0 = vweird.f32 %v336_v4 }
  0x8e   :  { %v40_v11 = vand.u32 31, %v38_v10  ;;  %v39_v14 = vshrl.u32 %v38_v10, 5 }
  0x90   :  { %v41_v13 = vsub.s32 32, %v40_v11  ;;  %v43_v16 = vshll.u32 %v307_v15, %v40_v11  ;;  %v46_v18 = vshll.u32 %v308_v17, %v40_v11  ;;  %v49_v22 = vshll.u32 %v309_v20, %v40_v11 }
  0x91   :  { %v52_v25 = vshll.u32 %v310_v23, %v40_v11  ;;  %v55_v28 = vshll.u32 %v311_v26, %v40_v11  ;;  %vm58_vm1 = vcmp.lt.s32.totalorder %v39_v14, 1  ;;  %vm61_vm2 = vcmp.lt.s32.totalorder %v39_v14, 4 }
  0x92   :  { %v44_v19 = vshrl.u32 %v308_v17, %v41_v13  ;;  %v47_v21 = vshrl.u32 %v309_v20, %v41_v13  ;;  %v50_v24 = vshrl.u32 %v310_v23, %v41_v13  ;;  %v53_v27 = vshrl.u32 %v311_v26, %v41_v13 }
  0x93   :  { %v56_v30 = vshrl.u32 %v312_v29, %v41_v13  ;;  %v42_v40 = vshrl.u32 %v307_v15, %v41_v13  ;;  %vm60_vm3 = vcmp.lt.s32.totalorder %v39_v14, 3  ;;  %vm59_vm4 = vcmp.lt.s32.totalorder %v39_v14, 2 }
  0x94   :  { %v45_v32 = vor.u32 %v44_v19, %v43_v16  ;;  %v48_v33 = vor.u32 %v47_v21, %v46_v18  ;;  %v51_v34 = vor.u32 %v50_v24, %v49_v22  ;;  %v54_v35 = vor.u32 %v53_v27, %v52_v25 }
  0x95   :  { %v57_v36 = vor.u32 %v56_v30, %v55_v28 }
  0x96   :  { %v63_v37 = vsel %vm61_vm2, %v51_v34, 2102212464  ;;  %v66_v38 = vsel %vm58_vm1, %v45_v32, %v48_v33  ;;  %v70_v39 = vsel %vm58_vm1, %v48_v33, %v51_v34  ;;  %v67_v41 = vsel %vm61_vm2, %v54_v35, 920167782 }
  0x97   :  { %v71_v42 = vsel %vm61_vm2, %v57_v36, 1326507024  ;;  %v68_v43 = vsel %vm60_vm3, %v51_v34, %v67_v41  ;;  %v62_v46 = vsel %vm58_vm1, %v42_v40, %v45_v32  ;;  %v64_v47 = vsel %vm60_vm3, %v48_v33, %v63_v37 }
  0x98   :  { %v72_v44 = vsel %vm60_vm3, %v54_v35, %v71_v42  ;;  %v69_v48 = vsel %vm59_vm4, %v66_v38, %v68_v43  ;;  %v65_v54 = vsel %vm59_vm4, %v62_v46, %v64_v47  ;;  %vm239_vm1 = vcmask 261248  }
  0x99   :  { %v73_v49 = vsel %vm59_vm4, %v70_v39, %v72_v44  ;;  %v345_v52 = vmul.u32.u64.low %v74_v45, %v69_v48  ;;  %v346_v53 = vmul.u32.u64.high %v74_v45, %v69_v48, %v345_v52  ;;  %v81_v56 = vmul.u32 %v74_v45, %v65_v54 }
  0x9a   :  { %v342_v50 = vmul.u32.u64.low %v74_v45, %v73_v49  ;;  %v343_v51 = vmul.u32.u64.high %v74_v45, %v73_v49, %v342_v50 }
  0x9b   :  { %v84_v55 = vadd.s32 1, %v346_v53 }
  0x9c   :  { %vm83_vm5 = vc.u32 %v343_v51, %v345_v52  ;;  %v82_v5 = vadd.s32 %v345_v52, %v343_v51 }
  0x9d   :  { %v85_v57 = vsel %vm83_vm5, %v84_v55, %v346_v53 }
  0x9e   :  { %v86_v58 = vadd.s32 %v85_v57, %v81_v56 }
  0xa0   :  { %v87_v59 = vadd.s32 536870912, %v86_v58 }
  0xa2   :  { %v88_v60 = vshrl.u32 %v87_v59, 30 }
  0xa4   :  { %v89_v61 = vshll.u32 %v88_v60, 30  ;;  %v112_v18 = vsub.s32 4, %v88_v60 }
  0xa6   :  { %v90_v62 = vsub.s32 %v86_v58, %v89_v61  ;;  %v113_v21 = vsel %vm28_vm7, %v112_v18, %v88_v60 }
  0xa7   :  { %v115_v23 = vsel %vm27_vm8, 0, %v113_v21 }
  0xa8   :  { %v92_v63 = vsub.s32 0, %v90_v62  ;;  %v119_v24 = vadd.s32 3, %v115_v23  ;;  %v225_v26 = vand.u32 3, %v115_v23 }
  0xaa   :  { %v257_v0 = vmin.u32 %v92_v63, %v90_v62  ;;  %v120_v25 = vand.u32 3, %v119_v24  ;;  %vm230_vm10 = vcmp.eq.s32.totalorder %v225_v26, 2  ;;  %vm227_vm13 = vcmp.eq.s32.totalorder %v225_v26, 0 }
  0xab   :  { %vm226_vm15 = vcmp.lt.s32.totalorder %v225_v26, 2 }
  0xac   :  { %v94_v1 = vclz %v257_v0  ;;  %vm125_vm9 = vcmp.eq.s32.totalorder %v120_v25, 2  ;;  %vm122_vm12 = vcmp.eq.s32.totalorder %v120_v25, 0  ;;  %vm121_vm14 = vcmp.lt.s32.totalorder %v120_v25, 2 }
  0xae   :  { %v258_v2 = vadd.s32 4294967294, %v94_v1 }
  0xb0   :  { %vm259_vm6 = vcmp.lt.s32.totalorder %v258_v2, 0 }
  0xb1   :  { %v97_v3 = vsel %vm259_vm6, 0, %v258_v2 }
  0xb2   :  { %v98_v6 = vsub.s32 32, %v97_v3  ;;  %v102_v7 = vsub.s32 4294967266, %v97_v3  ;;  %v99_v8 = vshll.u32 %v90_v62, %v97_v3 }
  0xb4   :  { %v100_v10 = vshrl.u32 %v82_v5, %v98_v6  ;;  %v103_v11 = vadd.s32 127, %v102_v7 }
  0xb6   :  { %v101_v12 = vor.u32 %v100_v10, %v99_v8  ;;  %v104_v13 = vshll.u32 %v103_v11, 23 }
  0xb8   :  { %v105_v14 = vor.u32 4788187, %v104_v13  ;;  %v108_v16 = vcvt.s32.f32 %v101_v12 }
  0xba   :  { %v106_v15 = vand.u32 2147483647, %v105_v14 }
  0xbc   :  { %v109_v17 = vmul.f32 %v108_v16, %v106_v15 }
  0xbe   :  { %v110_v19 = vxor.u32 2147483648, %v109_v17 }
  0xc0   :  { %v111_v20 = vsel %vm28_vm7, %v110_v19, %v109_v17 }
  0xc1   :  { %v114_v22 = vsel %vm27_vm8, %v336_v4, %v111_v20 }
  0xc2   :  { %278 = vcosq.f32 %v114_v22 }
  0xc3   :  { %280 = vsinq.f32 %v114_v22 }
  0xcc   :  { %v279_v27 = vpop.eup %278 }
  0xcd   :  { %v281_v28 = vpop.eup %280  ;;  %v126_v29 = vxor.u32 2147483648, %v279_v27 }
  0xce   :  { %v123_v30 = vxor.u32 2147483648, %v281_v28 }
  0xcf   :  { %v232_v31 = vsel %vm230_vm10, %v126_v29, %v281_v28  ;;  %v127_v9 = vsel %vm125_vm9, %v126_v29, %v281_v28 }
  0xd0   :  { %v229_v32 = vsel %vm227_vm13, %v279_v27, %v123_v30  ;;  %v124_v33 = vsel %vm122_vm12, %v279_v27, %v123_v30 }
  0xd1   :  { %v233_v34 = vsel %vm226_vm15, %v229_v32, %v232_v31  ;;  %v128_v35 = vsel %vm121_vm14, %v124_v33, %v127_v9 }
  0xd2   :  { %v234_v36 = vsel %vm118_vm0, nan, %v233_v34  ;;  %v129_v37 = vsel %vm118_vm0, nan, %v128_v35 }
  0xd3   :  { %236 = vrot.lane.b32.xlu0 %v234_v36, %s313_s0  ;;  %131 = vst.msk [vmem:[#allocation2] sm:$0xff] %vm130_vm11, %v129_v37 }
 0x145   :  { %v237_v38 = vpop.permute.xlu0 %236 }
 0x146   :  { %240 = vst.msk [vmem:[#allocation2] sm:$0xff] %vm239_vm1, %v237_v38 }
 0x147   :  { %293 = shalt.err (!%p290_p4)
}
 0x148   :  { %s294_s17 = scalar_lea.hbm %s372_s2, 128 }
 0x149   :  { %p295_p5 = scmp.ne.s32.totalorder %s372_s2, %s294_s17  ;;  %p298_p6 = scmp.lt.u32.totalorder %s294_s17, %s372_s2 }
 0x14b   :  { %p300_p7 = pnand %p298_p6, %p295_p5 }
 0x14d   :  { %303 = shalt.err (!%p300_p7)
}
 0x14e   :  { %250 = dma.vmem_to_hbm [thread:$0]  %s248_s13, 128, %s372_s2, [#allocation3]  }
 0x14f   :  { %304 = dma.done.wait [#allocation3], 128  }
 0x150   :  { %305 = vsyncadd [#allocation3], 4294967168 }
 0x151   :  { %254 = vsyncpa [#allocation3], 1 }

</bundles_post_ra>
